<compile_context>
chip_gen: v6e
topology: v6e:2x2x1
jax: 0.10.0
libtpu: 0.0.40
codegen_flags: <defaults>
</compile_context>

<pallas_src>
import jax
import jax.numpy as jnp
from jax.experimental import pallas as pl
from jax.experimental.pallas import tpu as pltpu

KH, KW = 5, 5
C_IN = 16
C_OUT = 120
C_PAD = 128                 # output channels padded to a full 128-lane vreg
K_RAW = KH * KW * C_IN      # 400 im2col features per output pixel
K_PAD = 512                 # padded to a multiple of 128 for unmasked lane loads
M_ACC_CAP = 256             # cap per-step accumulator rows -> (256,128) f32 = 32 vregs


def c3_kernel(p_ref, w_ref, b_ref, o_ref):
    # p_ref: (B_blk, M_pad, K_PAD)  im2col patches, lane-dense K
    # w_ref: (K_PAD, C_PAD)         im2col weight matrix (zero-padded), VMEM-resident
    # b_ref: (1, C_PAD)             bias (zero-padded)
    # o_ref: (B_blk, M_pad, C_PAD)  flattened-spatial, channel-last output
    b_blk, m_pad, k_pad = p_ref.shape
    # Merging the leading (batch) dim into the sublane dim is layout-free because
    # m_pad is a multiple of 8 and k_pad a multiple of 128.
    p = p_ref[...].reshape(b_blk * m_pad, k_pad)
    acc = jnp.dot(p, w_ref[...], preferred_element_type=jnp.float32)
    out = jnp.maximum(acc + b_ref[...], 0.0)                       # bias + ReLU
    o_ref[...] = out.reshape(b_blk, m_pad, C_PAD).astype(o_ref.dtype)


@jax.jit
def c3_forward(img, w, b):
    """img: (B, 16, H, W) f32; w: (120, 16, 5, 5); b: (120,). Returns (B, 120, H-4, W-4)."""
    B, C, H, W = img.shape
    assert C == C_IN and H >= KH and W >= KW
    OH, OW = H - KH + 1, W - KW + 1
    m_img = OH * OW

    # ---- wrapper glue (fused by XLA, ~200 KB total for LeNet shapes) -----------------
    # im2col: (B, OH*OW, 400) with feature ordering (kh, kw, c) — matches the weight
    # reshape below.  All 25 taps are static slices; no in-kernel relayout remains.
    x_nhwc = jnp.transpose(img, (0, 2, 3, 1))                       # (B, H, W, 16)
    taps = [x_nhwc[:, di:di + OH, dj:dj + OW, :]
            for di in range(KH) for dj in range(KW)]
    patches = jnp.concatenate(taps, axis=-1).reshape(B, m_img, K_RAW)

    # Weights -> (400, 120) with the same (kh, kw, c) row ordering, zero-padded lanes.
    w_mat = jnp.transpose(w, (2, 3, 1, 0)).reshape(K_RAW, C_OUT)
    w_mat = jnp.pad(w_mat, ((0, K_PAD - K_RAW), (0, C_PAD - C_OUT)))   # (512, 128)
    b_pad = jnp.pad(b, (0, C_PAD - C_OUT)).reshape(1, C_PAD)           # (1, 128)

    # Block sizing: fold as much batch as possible into one step while keeping the
    # accumulator <= (256, 128) f32; pad spatial rows to a multiple of 8 (sublanes).
    m_pad = -(-m_img // 8) * 8
    b_blk = min(B, max(1, M_ACC_CAP // m_pad))
    n_steps = pl.cdiv(B, b_blk)
    B_pad = n_steps * b_blk

    patches = jnp.pad(
        patches,
        ((0, B_pad - B), (0, m_pad - m_img), (0, K_PAD - K_RAW)))     # (B_pad, m_pad, 512)

    out_flat = pl.pallas_call(
        c3_kernel,
        out_shape=jax.ShapeDtypeStruct((B_pad, m_pad, C_PAD), img.dtype),
        grid=(n_steps,),
        in_specs=[
            pl.BlockSpec((b_blk, m_pad, K_PAD), lambda i: (i, 0, 0)),
            pl.BlockSpec((K_PAD, C_PAD), lambda i: (0, 0)),   # grid-invariant, resident
            pl.BlockSpec((1, C_PAD), lambda i: (0, 0)),       # grid-invariant, resident
        ],
        out_specs=pl.BlockSpec((b_blk, m_pad, C_PAD), lambda i: (i, 0, 0)),
        compiler_params=pltpu.CompilerParams(
            dimension_semantics=("parallel",)),
    )(patches, w_mat, b_pad)

    out = out_flat[:B, :m_img, :C_OUT].reshape(B, OH, OW, C_OUT)       # drop padding
    return jnp.transpose(out, (0, 3, 1, 2))                            # back to NCHW


def c3_reference(img, w, b):
    conv = jax.lax.conv_general_dilated(
        img, w, window_strides=(1, 1), padding="VALID",
        dimension_numbers=("NCHW", "OIHW", "NCHW"),
        precision=jax.lax.Precision.HIGHEST) + b.reshape(1, C_OUT, 1, 1)
    return jnp.maximum(conv, 0.0)


if __name__ == "__main__":
    key = jax.random.PRNGKey(0)
    kx, kw, kb = jax.random.split(key, 3)

    # Small shapes consistent with the module: Conv2d(16, 120, 5) + ReLU.
    B, H, W = 2, 12, 12
    img = jax.random.normal(kx, (B, C_IN, H, W), dtype=jnp.float32)
    w = jax.random.normal(kw, (C_OUT, C_IN, KH, KW), dtype=jnp.float32) * 0.1
    b = jax.random.normal(kb, (C_OUT,), dtype=jnp.float32) * 0.1

    out = jax.block_until_ready(c3_forward(img, w, b))
    ref = jax.block_until_ready(c3_reference(img, w, b))

    assert out.shape == (B, C_OUT, H - KH + 1, W - KW + 1), out.shape
    max_err = float(jnp.max(jnp.abs(out - ref)))
    assert jnp.allclose(out, ref, atol=2e-3, rtol=2e-3), max_err
    print("KERNEL_OK")
</pallas_src>

<mosaic_0001>
module attributes {stable_mosaic.version = 11 : i64} {
  func.func @c3_kernel(%arg0: i32, %arg1: memref<2x64x512xf32, #tpu.memory_space<vmem>>, %arg2: memref<512x128xf32, #tpu.memory_space<vmem>>, %arg3: memref<1x128xf32, #tpu.memory_space<vmem>>, %arg4: memref<2x64x128xf32, #tpu.memory_space<vmem>>) attributes {dimension_semantics = [#tpu.dimension_semantics<parallel>], iteration_bounds = array<i64: 1>, scalar_prefetch = 0 : i64, scratch_operands = 0 : i64, tpu.core_type = #tpu.core_type<tc>, window_params = [{transform_indices = @transform_0, window_bounds = array<i64: 2, 64, 512>}, {pipeline_mode = #tpu.pipeline_mode<synchronous>, transform_indices = @transform_1, window_bounds = array<i64: 512, 128>}, {pipeline_mode = #tpu.pipeline_mode<synchronous>, transform_indices = @transform_2, window_bounds = array<i64: 1, 128>}, {transform_indices = @transform_3, window_bounds = array<i64: 2, 64, 128>}]} {
    %c0 = arith.constant 0 : index
    %c0_0 = arith.constant 0 : index
    %c0_1 = arith.constant 0 : index
    %0 = vector.load %arg1[%c0, %c0_0, %c0_1] : memref<2x64x512xf32, #tpu.memory_space<vmem>>, vector<2x64x512xf32>
    %1 = vector.shape_cast %0 : vector<2x64x512xf32> to vector<128x512xf32>
    %c0_2 = arith.constant 0 : index
    %c0_3 = arith.constant 0 : index
    %2 = vector.load %arg2[%c0_2, %c0_3] : memref<512x128xf32, #tpu.memory_space<vmem>>, vector<512x128xf32>
    %cst = arith.constant dense<0.000000e+00> : vector<128x128xf32>
    %3 = tpu.matmul %1, %2, %cst {dimension_numbers = #tpu.dot_dimension_numbers<[1], [0], [0], [1], [0, 0, 1, 1], [], []>} : vector<128x512xf32>, vector<512x128xf32>, vector<128x128xf32> -> vector<128x128xf32>
    %c0_4 = arith.constant 0 : index
    %c0_5 = arith.constant 0 : index
    %4 = vector.load %arg3[%c0_4, %c0_5] : memref<1x128xf32, #tpu.memory_space<vmem>>, vector<1x128xf32>
    %5 = vector.broadcast %4 : vector<1x128xf32> to vector<128x128xf32>
    %6 = arith.addf %3, %5 : vector<128x128xf32>
    %cst_6 = arith.constant 0.000000e+00 : f32
    %7 = vector.broadcast %cst_6 : f32 to vector<128x128xf32>
    %8 = arith.maximumf %6, %7 : vector<128x128xf32>
    %9 = vector.shape_cast %8 : vector<128x128xf32> to vector<2x64x128xf32>
    %c0_7 = arith.constant 0 : index
    %c0_8 = arith.constant 0 : index
    %c0_9 = arith.constant 0 : index
    %10 = vector.load %arg4[%c0_7, %c0_8, %c0_9] : memref<2x64x128xf32, #tpu.memory_space<vmem>>, vector<2x64x128xf32>
    tpu.vector_store %arg4[%c0_7, %c0_8, %c0_9], %9 {strides = array<i32>} : memref<2x64x128xf32, #tpu.memory_space<vmem>>, vector<2x64x128xf32>,
    return
  }
  func.func @transform_0(%arg0: i32) -> (i32, i32, i32) {
    %c0_i32 = arith.constant 0 : i32
    %c0_i32_0 = arith.constant 0 : i32
    %c0_i32_1 = arith.constant 0 : i32
    return %arg0, %c0_i32, %c0_i32_0 : i32, i32, i32
  }
  func.func @transform_1(%arg0: i32) -> (i32, i32) {
    %c0_i32 = arith.constant 0 : i32
    %c0_i32_0 = arith.constant 0 : i32
    %c0_i32_1 = arith.constant 0 : i32
    return %c0_i32, %c0_i32_0 : i32, i32
  }
  func.func @transform_2(%arg0: i32) -> (i32, i32) {
    %c0_i32 = arith.constant 0 : i32
    %c0_i32_0 = arith.constant 0 : i32
    %c0_i32_1 = arith.constant 0 : i32
    return %c0_i32, %c0_i32_0 : i32, i32
  }
  func.func @transform_3(%arg0: i32) -> (i32, i32, i32) {
    %c0_i32 = arith.constant 0 : i32
    %c0_i32_0 = arith.constant 0 : i32
    %c0_i32_1 = arith.constant 0 : i32
    return %arg0, %c0_i32, %c0_i32_0 : i32, i32, i32
  }
}

</mosaic_0001>

<bundles_post_ra>
// kernel: c3_forward.1
= control target key start
LH: loop header
LB: loop body
LE: loop exit
PB: predicated region body
PF: predicated region fallthrough
CT: control target
= control target key end

     0   :  { %s1109_s1 = inlined_call_operand.vmem [shape: f32[512,128], index: 1, kind: input, shape index: {}]   ;;  %s1110_s0 = inlined_call_operand.vmem [shape: f32[2,64,512], index: 0, kind: input, shape index: {}]   ;;  %s1111_s2 = inlined_call_operand.vmem [shape: f32[1,128], index: 2, kind: input, shape index: {}]   ;;  %s1112_s3 = inlined_call_operand.vmem [shape: f32[2,64,128], index: 3, kind: output, shape index: {}]  }
   0x1   :  { %v109_v0 = vld [vmem:[%s1109_s1 + $0xf8] sm:$0xff]  ;;  %v108_v4 = vld [vmem:[%s1109_s1 + $0xf0] sm:$0xff]  ;;  %v107_v8 = vld [vmem:[%s1109_s1 + $0xe8] sm:$0xff] }
   0x2   :  { %v141_v1 = vld [vmem:[%s1109_s1 + $0x1f8] sm:$0xff]  ;;  %476 = vmatprep.subr.mxu0 %v109_v0  ;;  %v140_v5 = vld [vmem:[%s1109_s1 + $0x1f0] sm:$0xff]  ;;  %v139_v9 = vld [vmem:[%s1109_s1 + $0x1e8] sm:$0xff] }
   0x3   :  { %v93_v2 = vld [vmem:[%s1109_s1 + $0x78] sm:$0xff]  ;;  %556 = vmatprep.subr.mxu1 %v141_v1  ;;  %v92_v6 = vld [vmem:[%s1109_s1 + $0x70] sm:$0xff]  ;;  %v91_v10 = vld [vmem:[%s1109_s1 + $0x68] sm:$0xff] }
   0x4   :  { %v125_v3 = vld [vmem:[%s1109_s1 + $0x178] sm:$0xff]  ;;  %477 = vmatpush3.msra.mxu0 %v93_v2  ;;  %v124_v7 = vld [vmem:[%s1109_s1 + $0x170] sm:$0xff]  ;;  %v123_v11 = vld [vmem:[%s1109_s1 + $0x168] sm:$0xff] }
   0x5   :  { %557 = vmatpush3.msra.mxu1 %v125_v3  ;;  %478 = vmatprep.subr.mxu0 %v108_v4  ;;  %v106_v12 = vld [vmem:[%s1109_s1 + $0xe0] sm:$0xff]  ;;  %v105_v16 = vld [vmem:[%s1109_s1 + $0xd8] sm:$0xff]  ;;  %v104_v20 = vld [vmem:[%s1109_s1 + $0xd0] sm:$0xff] }
   0x6   :  { %558 = vmatprep.subr.mxu1 %v140_v5  ;;  %479 = vmatpush3.msra.mxu0 %v92_v6  ;;  %v138_v13 = vld [vmem:[%s1109_s1 + $0x1e0] sm:$0xff]  ;;  %v137_v17 = vld [vmem:[%s1109_s1 + $0x1d8] sm:$0xff]  ;;  %v136_v21 = vld [vmem:[%s1109_s1 + $0x1d0] sm:$0xff] }
   0x7   :  { %559 = vmatpush3.msra.mxu1 %v124_v7  ;;  %480 = vmatprep.subr.mxu0 %v107_v8  ;;  %v90_v14 = vld [vmem:[%s1109_s1 + $0x60] sm:$0xff]  ;;  %v89_v18 = vld [vmem:[%s1109_s1 + $0x58] sm:$0xff]  ;;  %v88_v22 = vld [vmem:[%s1109_s1 + $0x50] sm:$0xff] }
   0x8   :  { %560 = vmatprep.subr.mxu1 %v139_v9  ;;  %v122_v15 = vld [vmem:[%s1109_s1 + $0x160] sm:$0xff]  ;;  %481 = vmatpush3.msra.mxu0 %v91_v10  ;;  %v121_v19 = vld [vmem:[%s1109_s1 + $0x158] sm:$0xff]  ;;  %v120_v23 = vld [vmem:[%s1109_s1 + $0x150] sm:$0xff] }
   0x9   :  { %561 = vmatpush3.msra.mxu1 %v123_v11  ;;  %482 = vmatprep.subr.mxu0 %v106_v12  ;;  %v103_v24 = vld [vmem:[%s1109_s1 + $0xc8] sm:$0xff]  ;;  %v102_v28 = vld [vmem:[%s1109_s1 + $0xc0] sm:$0xff]  ;;  %v101_v32 = vld [vmem:[%s1109_s1 + $0xb8] sm:$0xff] }
   0xa   :  { %562 = vmatprep.subr.mxu1 %v138_v13  ;;  %483 = vmatpush3.msra.mxu0 %v90_v14  ;;  %v135_v25 = vld [vmem:[%s1109_s1 + $0x1c8] sm:$0xff]  ;;  %v134_v29 = vld [vmem:[%s1109_s1 + $0x1c0] sm:$0xff]  ;;  %v133_v33 = vld [vmem:[%s1109_s1 + $0x1b8] sm:$0xff] }
   0xb   :  { %563 = vmatpush3.msra.mxu1 %v122_v15  ;;  %484 = vmatprep.subr.mxu0 %v105_v16  ;;  %v87_v26 = vld [vmem:[%s1109_s1 + $0x48] sm:$0xff]  ;;  %v86_v30 = vld [vmem:[%s1109_s1 + $0x40] sm:$0xff]  ;;  %v85_v34 = vld [vmem:[%s1109_s1 + $0x38] sm:$0xff] }
   0xc   :  { %564 = vmatprep.subr.mxu1 %v137_v17  ;;  %485 = vmatpush3.msra.mxu0 %v89_v18  ;;  %v119_v27 = vld [vmem:[%s1109_s1 + $0x148] sm:$0xff]  ;;  %v118_v31 = vld [vmem:[%s1109_s1 + $0x140] sm:$0xff]  ;;  %v117_v35 = vld [vmem:[%s1109_s1 + $0x138] sm:$0xff] }
   0xd   :  { %565 = vmatpush3.msra.mxu1 %v121_v19  ;;  %486 = vmatprep.subr.mxu0 %v104_v20  ;;  %v100_v36 = vld [vmem:[%s1109_s1 + $0xb0] sm:$0xff]  ;;  %v99_v40 = vld [vmem:[%s1109_s1 + $0xa8] sm:$0xff]  ;;  %v98_v44 = vld [vmem:[%s1109_s1 + $0xa0] sm:$0xff] }
   0xe   :  { %566 = vmatprep.subr.mxu1 %v136_v21  ;;  %487 = vmatpush3.msra.mxu0 %v88_v22  ;;  %v132_v37 = vld [vmem:[%s1109_s1 + $0x1b0] sm:$0xff]  ;;  %v131_v41 = vld [vmem:[%s1109_s1 + $0x1a8] sm:$0xff]  ;;  %v130_v45 = vld [vmem:[%s1109_s1 + $0x1a0] sm:$0xff] }
   0xf   :  { %567 = vmatpush3.msra.mxu1 %v120_v23  ;;  %488 = vmatprep.subr.mxu0 %v103_v24  ;;  %v84_v38 = vld [vmem:[%s1109_s1 + $0x30] sm:$0xff]  ;;  %v83_v42 = vld [vmem:[%s1109_s1 + $0x28] sm:$0xff]  ;;  %v82_v46 = vld [vmem:[%s1109_s1 + $0x20] sm:$0xff] }
  0x10   :  { %568 = vmatprep.subr.mxu1 %v135_v25  ;;  %489 = vmatpush3.msra.mxu0 %v87_v26  ;;  %v116_v39 = vld [vmem:[%s1109_s1 + $0x130] sm:$0xff]  ;;  %v115_v43 = vld [vmem:[%s1109_s1 + $0x128] sm:$0xff]  ;;  %v114_v47 = vld [vmem:[%s1109_s1 + $0x120] sm:$0xff] }
  0x11   :  { %569 = vmatpush3.msra.mxu1 %v119_v27  ;;  %490 = vmatprep.subr.mxu0 %v102_v28  ;;  %v97_v48 = vld [vmem:[%s1109_s1 + $0x98] sm:$0xff]  ;;  %v96_v52 = vld [vmem:[%s1109_s1 + $0x90] sm:$0xff]  ;;  %v95_v56 = vld [vmem:[%s1109_s1 + $0x88] sm:$0xff] }
  0x12   :  { %570 = vmatprep.subr.mxu1 %v134_v29  ;;  %491 = vmatpush3.msra.mxu0 %v86_v30  ;;  %v129_v49 = vld [vmem:[%s1109_s1 + $0x198] sm:$0xff]  ;;  %v128_v53 = vld [vmem:[%s1109_s1 + $0x190] sm:$0xff]  ;;  %v127_v57 = vld [vmem:[%s1109_s1 + $0x188] sm:$0xff] }
  0x13   :  { %571 = vmatpush3.msra.mxu1 %v118_v31  ;;  %492 = vmatprep.subr.mxu0 %v101_v32  ;;  %v81_v50 = vld [vmem:[%s1109_s1 + $0x18] sm:$0xff]  ;;  %v80_v54 = vld [vmem:[%s1109_s1 + $0x10] sm:$0xff]  ;;  %v79_v58 = vld [vmem:[%s1109_s1 + $0x8] sm:$0xff] }
  0x14   :  { %572 = vmatprep.subr.mxu1 %v133_v33  ;;  %493 = vmatpush3.msra.mxu0 %v85_v34  ;;  %v113_v51 = vld [vmem:[%s1109_s1 + $0x118] sm:$0xff]  ;;  %v112_v55 = vld [vmem:[%s1109_s1 + $0x110] sm:$0xff]  ;;  %v111_v59 = vld [vmem:[%s1109_s1 + $0x108] sm:$0xff] }
  0x15   :  { %573 = vmatpush3.msra.mxu1 %v117_v35  ;;  %494 = vmatprep.subr.mxu0 %v100_v36  ;;  %v94_v60 = vld [vmem:[%s1109_s1 + $0x80] sm:$0xff]  ;;  %v15_v63 = vld [vmem:[%s1110_s0 + $0x8] sm:$0xff]  ;;  %v17_v1 = vld [vmem:[%s1110_s0 + $0x18] sm:$0xff] }
  0x16   :  { %574 = vmatprep.subr.mxu1 %v132_v37  ;;  %495 = vmatpush3.msra.mxu0 %v84_v38  ;;  %v126_v61 = vld [vmem:[%s1109_s1 + $0x180] sm:$0xff]  ;;  %v16_v3 = vld [vmem:[%s1110_s0 + $0x10] sm:$0xff]  ;;  %v19_v4 = vld [vmem:[%s1110_s0 + $0x28] sm:$0xff] }
  0x17   :  { %575 = vmatpush3.msra.mxu1 %v116_v39  ;;  %496 = vmatprep.subr.mxu0 %v99_v40  ;;  %v78_v62 = vld [vmem:[%s1109_s1] sm:$0xff]  ;;  %v21_v5 = vld [vmem:[%s1110_s0 + $0x38] sm:$0xff]  ;;  %v20_v7 = vld [vmem:[%s1110_s0 + $0x30] sm:$0xff] }
  0x18   :  { %576 = vmatprep.subr.mxu1 %v131_v41  ;;  %497 = vmatpush3.msra.mxu0 %v83_v42  ;;  %v110_v0 = vld [vmem:[%s1109_s1 + $0x100] sm:$0xff]  ;;  %v23_v8 = vld [vmem:[%s1110_s0 + $0x48] sm:$0xff]  ;;  %v25_v9 = vld [vmem:[%s1110_s0 + $0x58] sm:$0xff] }
  0x19   :  { %577 = vmatpush3.msra.mxu1 %v115_v43  ;;  %498 = vmatprep.subr.mxu0 %v98_v44  ;;  %v14_v2 = vld [vmem:[%s1110_s0] sm:$0xff]  ;;  %v24_v11 = vld [vmem:[%s1110_s0 + $0x50] sm:$0xff]  ;;  %v27_v12 = vld [vmem:[%s1110_s0 + $0x68] sm:$0xff] }
  0x1a   :  { %578 = vmatprep.subr.mxu1 %v130_v45  ;;  %499 = vmatpush3.msra.mxu0 %v82_v46  ;;  %v18_v6 = vld [vmem:[%s1110_s0 + $0x20] sm:$0xff]  ;;  %v29_v13 = vld [vmem:[%s1110_s0 + $0x78] sm:$0xff]  ;;  %v28_v15 = vld [vmem:[%s1110_s0 + $0x70] sm:$0xff] }
  0x1b   :  { %579 = vmatpush3.msra.mxu1 %v114_v47  ;;  %500 = vmatprep.subr.mxu0 %v97_v48  ;;  %v22_v10 = vld [vmem:[%s1110_s0 + $0x40] sm:$0xff]  ;;  %v31_v16 = vld [vmem:[%s1110_s0 + $0x88] sm:$0xff]  ;;  %v33_v17 = vld [vmem:[%s1110_s0 + $0x98] sm:$0xff] }
  0x1c   :  { %580 = vmatprep.subr.mxu1 %v129_v49  ;;  %501 = vmatpush3.msra.mxu0 %v81_v50  ;;  %v26_v14 = vld [vmem:[%s1110_s0 + $0x60] sm:$0xff]  ;;  %v32_v19 = vld [vmem:[%s1110_s0 + $0x90] sm:$0xff]  ;;  %v35_v20 = vld [vmem:[%s1110_s0 + $0xa8] sm:$0xff] }
  0x1d   :  { %581 = vmatpush3.msra.mxu1 %v113_v51  ;;  %502 = vmatprep.subr.mxu0 %v96_v52  ;;  %v30_v18 = vld [vmem:[%s1110_s0 + $0x80] sm:$0xff]  ;;  %v37_v21 = vld [vmem:[%s1110_s0 + $0xb8] sm:$0xff]  ;;  %v36_v23 = vld [vmem:[%s1110_s0 + $0xb0] sm:$0xff] }
  0x1e   :  { %582 = vmatprep.subr.mxu1 %v128_v53  ;;  %503 = vmatpush3.msra.mxu0 %v80_v54  ;;  %v34_v22 = vld [vmem:[%s1110_s0 + $0xa0] sm:$0xff]  ;;  %v39_v24 = vld [vmem:[%s1110_s0 + $0xc8] sm:$0xff]  ;;  %v41_v25 = vld [vmem:[%s1110_s0 + $0xd8] sm:$0xff] }
  0x1f   :  { %583 = vmatpush3.msra.mxu1 %v112_v55  ;;  %504 = vmatprep.subr.mxu0 %v95_v56  ;;  %v38_v26 = vld [vmem:[%s1110_s0 + $0xc0] sm:$0xff]  ;;  %v40_v27 = vld [vmem:[%s1110_s0 + $0xd0] sm:$0xff]  ;;  %v43_v28 = vld [vmem:[%s1110_s0 + $0xe8] sm:$0xff] }
  0x20   :  { %584 = vmatprep.subr.mxu1 %v127_v57  ;;  %505 = vmatpush3.msra.mxu0 %v79_v58  ;;  %v45_v29 = vld [vmem:[%s1110_s0 + $0xf8] sm:$0xff]  ;;  %v42_v30 = vld [vmem:[%s1110_s0 + $0xe0] sm:$0xff]  ;;  %v44_v31 = vld [vmem:[%s1110_s0 + $0xf0] sm:$0xff] }
  0x21   :  { %585 = vmatpush3.msra.mxu1 %v111_v59  ;;  %506 = vmatprep.subr.mxu0 %v94_v60  ;;  %v47_v32 = vld [vmem:[%s1110_s0 + $0x108] sm:$0xff]  ;;  %v49_v33 = vld [vmem:[%s1110_s0 + $0x118] sm:$0xff]  ;;  %v46_v34 = vld [vmem:[%s1110_s0 + $0x100] sm:$0xff] }
  0x22   :  { %586 = vmatprep.subr.mxu1 %v126_v61  ;;  %507 = vmatpush3.msra.mxu0 %v78_v62  ;;  %v48_v35 = vld [vmem:[%s1110_s0 + $0x110] sm:$0xff]  ;;  %v51_v36 = vld [vmem:[%s1110_s0 + $0x128] sm:$0xff]  ;;  %v53_v37 = vld [vmem:[%s1110_s0 + $0x138] sm:$0xff] }
  0x23   :  { %213 = vmatprep.mubr.f32.mxu0 %v15_v63  ;;  %587 = vmatpush3.msra.mxu1 %v110_v0  ;;  %v50_v38 = vld [vmem:[%s1110_s0 + $0x120] sm:$0xff]  ;;  %v52_v39 = vld [vmem:[%s1110_s0 + $0x130] sm:$0xff]  ;;  %v55_v40 = vld [vmem:[%s1110_s0 + $0x148] sm:$0xff] }
  0x24   :  { %358 = vmatprep.mubr.f32.mxu1 %v17_v1  ;;  %214 = vmatmul.mubr.f32.vlgmr.msra.gmra.mxu0 %v14_v2  ;;  %v57_v41 = vld [vmem:[%s1110_s0 + $0x158] sm:$0xff]  ;;  %v54_v42 = vld [vmem:[%s1110_s0 + $0x140] sm:$0xff]  ;;  %v56_v43 = vld [vmem:[%s1110_s0 + $0x150] sm:$0xff] }
  0x25   :  { %359 = vmatmul.mubr.f32.vlgmr.msra.gmra.mxu1 %v16_v3  ;;  %218 = vmatprep.mubr.f32.mxu0 %v19_v4  ;;  %v59_v44 = vld [vmem:[%s1110_s0 + $0x168] sm:$0xff]  ;;  %v61_v45 = vld [vmem:[%s1110_s0 + $0x178] sm:$0xff]  ;;  %v58_v46 = vld [vmem:[%s1110_s0 + $0x160] sm:$0xff] }
  0x26   :  { %363 = vmatprep.mubr.f32.mxu1 %v21_v5  ;;  %v60_v47 = vld [vmem:[%s1110_s0 + $0x170] sm:$0xff]  ;;  %v63_v48 = vld [vmem:[%s1110_s0 + $0x188] sm:$0xff]  ;;  %v65_v49 = vld [vmem:[%s1110_s0 + $0x198] sm:$0xff] }
  0x27   :  { %v62_v50 = vld [vmem:[%s1110_s0 + $0x180] sm:$0xff]  ;;  %v64_v51 = vld [vmem:[%s1110_s0 + $0x190] sm:$0xff]  ;;  %v67_v52 = vld [vmem:[%s1110_s0 + $0x1a8] sm:$0xff] }
  0x28   :  { %219 = vmatmul.mubr.f32.gmra.mxu0 %v18_v6  ;;  %v69_v53 = vld [vmem:[%s1110_s0 + $0x1b8] sm:$0xff]  ;;  %v66_v54 = vld [vmem:[%s1110_s0 + $0x1a0] sm:$0xff]  ;;  %v68_v55 = vld [vmem:[%s1110_s0 + $0x1b0] sm:$0xff] }
  0x29   :  { %364 = vmatmul.mubr.f32.gmra.mxu1 %v20_v7  ;;  %223 = vmatprep.mubr.f32.mxu0 %v23_v8  ;;  %v71_v56 = vld [vmem:[%s1110_s0 + $0x1c8] sm:$0xff]  ;;  %v73_v57 = vld [vmem:[%s1110_s0 + $0x1d8] sm:$0xff]  ;;  %v70_v58 = vld [vmem:[%s1110_s0 + $0x1c0] sm:$0xff] }
  0x2a   :  { %368 = vmatprep.mubr.f32.mxu1 %v25_v9  ;;  %v72_v59 = vld [vmem:[%s1110_s0 + $0x1d0] sm:$0xff]  ;;  %v75_v60 = vld [vmem:[%s1110_s0 + $0x1e8] sm:$0xff]  ;;  %v77_v61 = vld [vmem:[%s1110_s0 + $0x1f8] sm:$0xff] }
  0x2b   :  { %v74_v62 = vld [vmem:[%s1110_s0 + $0x1e0] sm:$0xff]  ;;  %v76_v63 = vld [vmem:[%s1110_s0 + $0x1f0] sm:$0xff] }
  0x2c   :  { %224 = vmatmul.mubr.f32.gmra.mxu0 %v22_v10  ;;  %v1043_v2 = vld [vmem:[%s1111_s2] ss:$0 sm:$0xff] }
  0x2d   :  { %369 = vmatmul.mubr.f32.gmra.mxu1 %v24_v11  ;;  %228 = vmatprep.mubr.f32.mxu0 %v27_v12 }
  0x2e   :  { %373 = vmatprep.mubr.f32.mxu1 %v29_v13 }
  0x30   :  { %229 = vmatmul.mubr.f32.gmra.mxu0 %v26_v14 }
  0x31   :  { %374 = vmatmul.mubr.f32.gmra.mxu1 %v28_v15  ;;  %233 = vmatprep.mubr.f32.mxu0 %v31_v16 }
  0x32   :  { %378 = vmatprep.mubr.f32.mxu1 %v33_v17 }
  0x34   :  { %234 = vmatmul.mubr.f32.gmra.mxu0 %v30_v18 }
  0x35   :  { %379 = vmatmul.mubr.f32.gmra.mxu1 %v32_v19  ;;  %238 = vmatprep.mubr.f32.mxu0 %v35_v20 }
  0x36   :  { %383 = vmatprep.mubr.f32.mxu1 %v37_v21 }
  0x38   :  { %239 = vmatmul.mubr.f32.gmra.mxu0 %v34_v22 }
  0x39   :  { %384 = vmatmul.mubr.f32.gmra.mxu1 %v36_v23  ;;  %243 = vmatprep.mubr.f32.mxu0 %v39_v24 }
  0x3a   :  { %388 = vmatprep.mubr.f32.mxu1 %v41_v25 }
  0x3c   :  { %244 = vmatmul.mubr.f32.gmra.mxu0 %v38_v26 }
  0x3d   :  { %389 = vmatmul.mubr.f32.gmra.mxu1 %v40_v27  ;;  %248 = vmatprep.mubr.f32.mxu0 %v43_v28 }
  0x3e   :  { %393 = vmatprep.mubr.f32.mxu1 %v45_v29 }
  0x40   :  { %249 = vmatmul.mubr.f32.gmra.mxu0 %v42_v30 }
  0x41   :  { %394 = vmatmul.mubr.f32.gmra.mxu1 %v44_v31  ;;  %253 = vmatprep.mubr.f32.mxu0 %v47_v32 }
  0x42   :  { %398 = vmatprep.mubr.f32.mxu1 %v49_v33 }
  0x44   :  { %254 = vmatmul.mubr.f32.gmra.mxu0 %v46_v34 }
  0x45   :  { %399 = vmatmul.mubr.f32.gmra.mxu1 %v48_v35  ;;  %258 = vmatprep.mubr.f32.mxu0 %v51_v36 }
  0x46   :  { %403 = vmatprep.mubr.f32.mxu1 %v53_v37 }
  0x48   :  { %259 = vmatmul.mubr.f32.gmra.mxu0 %v50_v38 }
  0x49   :  { %404 = vmatmul.mubr.f32.gmra.mxu1 %v52_v39  ;;  %263 = vmatprep.mubr.f32.mxu0 %v55_v40 }
  0x4a   :  { %408 = vmatprep.mubr.f32.mxu1 %v57_v41 }
  0x4c   :  { %264 = vmatmul.mubr.f32.gmra.mxu0 %v54_v42 }
  0x4d   :  { %409 = vmatmul.mubr.f32.gmra.mxu1 %v56_v43  ;;  %268 = vmatprep.mubr.f32.mxu0 %v59_v44 }
  0x4e   :  { %413 = vmatprep.mubr.f32.mxu1 %v61_v45 }
  0x50   :  { %269 = vmatmul.mubr.f32.gmra.mxu0 %v58_v46 }
  0x51   :  { %414 = vmatmul.mubr.f32.gmra.mxu1 %v60_v47  ;;  %273 = vmatprep.mubr.f32.mxu0 %v63_v48 }
  0x52   :  { %418 = vmatprep.mubr.f32.mxu1 %v65_v49 }
  0x54   :  { %274 = vmatmul.mubr.f32.gmra.mxu0 %v62_v50 }
  0x55   :  { %419 = vmatmul.mubr.f32.gmra.mxu1 %v64_v51  ;;  %278 = vmatprep.mubr.f32.mxu0 %v67_v52 }
  0x56   :  { %423 = vmatprep.mubr.f32.mxu1 %v69_v53 }
  0x58   :  { %279 = vmatmul.mubr.f32.gmra.mxu0 %v66_v54 }
  0x59   :  { %424 = vmatmul.mubr.f32.gmra.mxu1 %v68_v55  ;;  %283 = vmatprep.mubr.f32.mxu0 %v71_v56 }
  0x5a   :  { %428 = vmatprep.mubr.f32.mxu1 %v73_v57 }
  0x5c   :  { %284 = vmatmul.mubr.f32.gmra.mxu0 %v70_v58 }
  0x5d   :  { %429 = vmatmul.mubr.f32.gmra.mxu1 %v72_v59  ;;  %288 = vmatprep.mubr.f32.mxu0 %v75_v60 }
  0x5e   :  { %433 = vmatprep.mubr.f32.mxu1 %v77_v61 }
  0x60   :  { %289 = vmatmul.mubr.f32.gmra.mxu0 %v74_v62 }
  0x61   :  { %434 = vmatmul.mubr.f32.gmra.mxu1 %v76_v63 }
  0xe4   :  { %v508_v0 = vpop.f32.mrf.mxu0 }
  0xe5   :  { %v588_v1 = vpop.f32.mrf.mxu1 }
  0xe6   :  { %v509_v3 = vpop.f32.mrf.mxu0 }
  0xe7   :  { %v589_v4 = vpop.f32.mrf.mxu1  ;;  %v510_v5 = vadd.f32 %v509_v3, %v508_v0 }
  0xe8   :  { %v511_v6 = vpop.f32.mrf.mxu0  ;;  %v590_v9 = vadd.f32 %v589_v4, %v588_v1 }
  0xe9   :  { %v591_v7 = vpop.f32.mrf.mxu1  ;;  %v216_v8 = vadd.f32 %v510_v5, %v1043_v2 }
  0xea   :  { %v512_v10 = vpop.f32.mrf.mxu0 }
  0xeb   :  { %v592_v11 = vpop.f32.mrf.mxu1  ;;  %v361_v12 = vadd.f32 %v590_v9, %v216_v8  ;;  %v513_v13 = vadd.f32 %v512_v10, %v511_v6 }
  0xec   :  { %v514_v14 = vpop.f32.mrf.mxu0  ;;  %v593_v18 = vadd.f32 %v592_v11, %v591_v7 }
  0xed   :  { %v594_v15 = vpop.f32.mrf.mxu1  ;;  %v439_v16 = vmax.f32 %v361_v12, 0.0  ;;  %v221_v17 = vadd.f32 %v513_v13, %v1043_v2 }
  0xee   :  { %v515_v19 = vpop.f32.mrf.mxu0 }
  0xef   :  { %v595_v20 = vpop.f32.mrf.mxu1  ;;  %455 = vst [vmem:[%s1112_s3] sm:$0xff] %v439_v16  ;;  %v366_v21 = vadd.f32 %v593_v18, %v221_v17  ;;  %v516_v22 = vadd.f32 %v515_v19, %v514_v14 }
  0xf0   :  { %v517_v23 = vpop.f32.mrf.mxu0  ;;  %v596_v27 = vadd.f32 %v595_v20, %v594_v15 }
  0xf1   :  { %v597_v24 = vpop.f32.mrf.mxu1  ;;  %v440_v25 = vmax.f32 %v366_v21, 0.0  ;;  %v226_v26 = vadd.f32 %v516_v22, %v1043_v2 }
  0xf2   :  { %v518_v28 = vpop.f32.mrf.mxu0 }
  0xf3   :  { %v598_v29 = vpop.f32.mrf.mxu1  ;;  %456 = vst [vmem:[%s1112_s3 + $0x8] sm:$0xff] %v440_v25  ;;  %v371_v30 = vadd.f32 %v596_v27, %v226_v26  ;;  %v519_v31 = vadd.f32 %v518_v28, %v517_v23 }
  0xf4   :  { %v520_v32 = vpop.f32.mrf.mxu0  ;;  %v599_v36 = vadd.f32 %v598_v29, %v597_v24 }
  0xf5   :  { %v600_v33 = vpop.f32.mrf.mxu1  ;;  %v441_v34 = vmax.f32 %v371_v30, 0.0  ;;  %v231_v35 = vadd.f32 %v519_v31, %v1043_v2 }
  0xf6   :  { %v521_v37 = vpop.f32.mrf.mxu0 }
  0xf7   :  { %v601_v38 = vpop.f32.mrf.mxu1  ;;  %457 = vst [vmem:[%s1112_s3 + $0x10] sm:$0xff] %v441_v34  ;;  %v376_v39 = vadd.f32 %v599_v36, %v231_v35  ;;  %v522_v40 = vadd.f32 %v521_v37, %v520_v32 }
  0xf8   :  { %v523_v41 = vpop.f32.mrf.mxu0  ;;  %v602_v45 = vadd.f32 %v601_v38, %v600_v33 }
  0xf9   :  { %v603_v42 = vpop.f32.mrf.mxu1  ;;  %v442_v43 = vmax.f32 %v376_v39, 0.0  ;;  %v236_v44 = vadd.f32 %v522_v40, %v1043_v2 }
  0xfa   :  { %v524_v46 = vpop.f32.mrf.mxu0 }
  0xfb   :  { %v604_v47 = vpop.f32.mrf.mxu1  ;;  %458 = vst [vmem:[%s1112_s3 + $0x18] sm:$0xff] %v442_v43  ;;  %v381_v48 = vadd.f32 %v602_v45, %v236_v44  ;;  %v525_v49 = vadd.f32 %v524_v46, %v523_v41 }
  0xfc   :  { %v526_v50 = vpop.f32.mrf.mxu0  ;;  %v605_v54 = vadd.f32 %v604_v47, %v603_v42 }
  0xfd   :  { %v606_v51 = vpop.f32.mrf.mxu1  ;;  %v443_v52 = vmax.f32 %v381_v48, 0.0  ;;  %v241_v53 = vadd.f32 %v525_v49, %v1043_v2 }
  0xfe   :  { %v527_v55 = vpop.f32.mrf.mxu0 }
  0xff   :  { %v607_v56 = vpop.f32.mrf.mxu1  ;;  %459 = vst [vmem:[%s1112_s3 + $0x20] sm:$0xff] %v443_v52  ;;  %v386_v57 = vadd.f32 %v605_v54, %v241_v53  ;;  %v528_v58 = vadd.f32 %v527_v55, %v526_v50 }
 0x100   :  { %v529_v59 = vpop.f32.mrf.mxu0  ;;  %v608_v63 = vadd.f32 %v607_v56, %v606_v51 }
 0x101   :  { %v609_v60 = vpop.f32.mrf.mxu1  ;;  %v444_v61 = vmax.f32 %v386_v57, 0.0  ;;  %v246_v62 = vadd.f32 %v528_v58, %v1043_v2 }
 0x102   :  { %v530_v0 = vpop.f32.mrf.mxu0 }
 0x103   :  { %v610_v1 = vpop.f32.mrf.mxu1  ;;  %460 = vst [vmem:[%s1112_s3 + $0x28] sm:$0xff] %v444_v61  ;;  %v391_v3 = vadd.f32 %v608_v63, %v246_v62  ;;  %v531_v4 = vadd.f32 %v530_v0, %v529_v59 }
 0x104   :  { %v532_v5 = vpop.f32.mrf.mxu0  ;;  %v611_v9 = vadd.f32 %v610_v1, %v609_v60 }
 0x105   :  { %v612_v6 = vpop.f32.mrf.mxu1  ;;  %v445_v7 = vmax.f32 %v391_v3, 0.0  ;;  %v251_v8 = vadd.f32 %v531_v4, %v1043_v2 }
 0x106   :  { %v533_v10 = vpop.f32.mrf.mxu0 }
 0x107   :  { %v613_v11 = vpop.f32.mrf.mxu1  ;;  %461 = vst [vmem:[%s1112_s3 + $0x30] sm:$0xff] %v445_v7  ;;  %v396_v12 = vadd.f32 %v611_v9, %v251_v8  ;;  %v534_v13 = vadd.f32 %v533_v10, %v532_v5 }
 0x108   :  { %v535_v14 = vpop.f32.mrf.mxu0  ;;  %v614_v18 = vadd.f32 %v613_v11, %v612_v6 }
 0x109   :  { %v615_v15 = vpop.f32.mrf.mxu1  ;;  %v446_v16 = vmax.f32 %v396_v12, 0.0  ;;  %v256_v17 = vadd.f32 %v534_v13, %v1043_v2 }
 0x10a   :  { %v536_v19 = vpop.f32.mrf.mxu0 }
 0x10b   :  { %v616_v20 = vpop.f32.mrf.mxu1  ;;  %462 = vst [vmem:[%s1112_s3 + $0x38] sm:$0xff] %v446_v16  ;;  %v401_v21 = vadd.f32 %v614_v18, %v256_v17  ;;  %v537_v22 = vadd.f32 %v536_v19, %v535_v14 }
 0x10c   :  { %v538_v23 = vpop.f32.mrf.mxu0  ;;  %v617_v27 = vadd.f32 %v616_v20, %v615_v15 }
 0x10d   :  { %v618_v24 = vpop.f32.mrf.mxu1  ;;  %v447_v25 = vmax.f32 %v401_v21, 0.0  ;;  %v261_v26 = vadd.f32 %v537_v22, %v1043_v2 }
 0x10e   :  { %v539_v28 = vpop.f32.mrf.mxu0 }
 0x10f   :  { %v619_v29 = vpop.f32.mrf.mxu1  ;;  %463 = vst [vmem:[%s1112_s3 + $0x40] sm:$0xff] %v447_v25  ;;  %v406_v30 = vadd.f32 %v617_v27, %v261_v26  ;;  %v540_v31 = vadd.f32 %v539_v28, %v538_v23 }
 0x110   :  { %v541_v32 = vpop.f32.mrf.mxu0  ;;  %v620_v36 = vadd.f32 %v619_v29, %v618_v24 }
 0x111   :  { %v621_v33 = vpop.f32.mrf.mxu1  ;;  %v448_v34 = vmax.f32 %v406_v30, 0.0  ;;  %v266_v35 = vadd.f32 %v540_v31, %v1043_v2 }
 0x112   :  { %v542_v37 = vpop.f32.mrf.mxu0 }
 0x113   :  { %v622_v38 = vpop.f32.mrf.mxu1  ;;  %464 = vst [vmem:[%s1112_s3 + $0x48] sm:$0xff] %v448_v34  ;;  %v411_v39 = vadd.f32 %v620_v36, %v266_v35  ;;  %v543_v40 = vadd.f32 %v542_v37, %v541_v32 }
 0x114   :  { %v544_v41 = vpop.f32.mrf.mxu0  ;;  %v623_v45 = vadd.f32 %v622_v38, %v621_v33 }
 0x115   :  { %v624_v42 = vpop.f32.mrf.mxu1  ;;  %v449_v43 = vmax.f32 %v411_v39, 0.0  ;;  %v271_v44 = vadd.f32 %v543_v40, %v1043_v2 }
 0x116   :  { %v545_v46 = vpop.f32.mrf.mxu0 }
 0x117   :  { %v625_v47 = vpop.f32.mrf.mxu1  ;;  %465 = vst [vmem:[%s1112_s3 + $0x50] sm:$0xff] %v449_v43  ;;  %v416_v48 = vadd.f32 %v623_v45, %v271_v44  ;;  %v546_v49 = vadd.f32 %v545_v46, %v544_v41 }
 0x118   :  { %v547_v50 = vpop.f32.mrf.mxu0  ;;  %v626_v54 = vadd.f32 %v625_v47, %v624_v42 }
 0x119   :  { %v627_v51 = vpop.f32.mrf.mxu1  ;;  %v450_v52 = vmax.f32 %v416_v48, 0.0  ;;  %v276_v53 = vadd.f32 %v546_v49, %v1043_v2 }
 0x11a   :  { %v548_v55 = vpop.f32.mrf.mxu0 }
 0x11b   :  { %v628_v56 = vpop.f32.mrf.mxu1  ;;  %466 = vst [vmem:[%s1112_s3 + $0x58] sm:$0xff] %v450_v52  ;;  %v421_v57 = vadd.f32 %v626_v54, %v276_v53  ;;  %v549_v58 = vadd.f32 %v548_v55, %v547_v50 }
 0x11c   :  { %v550_v59 = vpop.f32.mrf.mxu0  ;;  %v629_v63 = vadd.f32 %v628_v56, %v627_v51 }
 0x11d   :  { %v630_v60 = vpop.f32.mrf.mxu1  ;;  %v451_v61 = vmax.f32 %v421_v57, 0.0  ;;  %v281_v62 = vadd.f32 %v549_v58, %v1043_v2 }
 0x11e   :  { %v551_v0 = vpop.f32.mrf.mxu0 }
 0x11f   :  { %v631_v1 = vpop.f32.mrf.mxu1  ;;  %467 = vst [vmem:[%s1112_s3 + $0x60] sm:$0xff] %v451_v61  ;;  %v426_v3 = vadd.f32 %v629_v63, %v281_v62  ;;  %v552_v4 = vadd.f32 %v551_v0, %v550_v59 }
 0x120   :  { %v553_v5 = vpop.f32.mrf.mxu0  ;;  %v632_v9 = vadd.f32 %v631_v1, %v630_v60 }
 0x121   :  { %v633_v6 = vpop.f32.mrf.mxu1  ;;  %v452_v7 = vmax.f32 %v426_v3, 0.0  ;;  %v286_v8 = vadd.f32 %v552_v4, %v1043_v2 }
 0x122   :  { %v554_v10 = vpop.f32.mrf.mxu0 }
 0x123   :  { %v634_v11 = vpop.f32.mrf.mxu1  ;;  %468 = vst [vmem:[%s1112_s3 + $0x68] sm:$0xff] %v452_v7  ;;  %v431_v12 = vadd.f32 %v632_v9, %v286_v8  ;;  %v555_v13 = vadd.f32 %v554_v10, %v553_v5 }
 0x124   :  { %v635_v16 = vadd.f32 %v634_v11, %v633_v6 }
 0x125   :  { %v453_v14 = vmax.f32 %v431_v12, 0.0  ;;  %v291_v15 = vadd.f32 %v555_v13, %v1043_v2 }
 0x127   :  { %469 = vst [vmem:[%s1112_s3 + $0x70] sm:$0xff] %v453_v14  ;;  %v436_v17 = vadd.f32 %v635_v16, %v291_v15 }
 0x129   :  { %v454_v18 = vmax.f32 %v436_v17, 0.0 }
 0x12b   :  { %470 = vst [vmem:[%s1112_s3 + $0x78] sm:$0xff] %v454_v18 }

</bundles_post_ra>
